<compile_context>
chip_gen: v6e
topology: v6e:2x2x1
jax: 0.10.0
libtpu: 0.0.40
codegen_flags: <defaults>
</compile_context>

<pallas_src>
import jax
import jax.numpy as jnp
from jax import lax
from jax.experimental import pallas as pl
from jax.experimental.pallas import tpu as pltpu


def _round_up(n, m):
    return ((n + m - 1) // m) * m


def _make_kernel(*, margin, w, tc, precision):
    margin = float(margin)
    w = float(w)

    def kernel(x_ref, c_ref, csq_ref, xsq_ref, labels_ref, out_ref,
               dist_ref, dmin_ref):
        # Grid position read ONCE at kernel top level (never inside pl.when).
        ct = pl.program_id(1)                 # class-tile index (reduction axis)
        nct = pl.num_programs(1)

        @pl.when(ct == 0)
        def _init():
            dist_ref[...] = jnp.zeros(dist_ref.shape, jnp.float32)
            dmin_ref[...] = jnp.full(dmin_ref.shape, jnp.inf, jnp.float32)

        # MXU: (TB, D) @ (D, TC) in natural (M,K)x(K,N) layout, f32 accumulate.
        xc = jnp.dot(x_ref[...], c_ref[...],
                     preferred_element_type=jnp.float32,
                     precision=precision)                      # (TB, TC) f32

        distmat = xsq_ref[...] + csq_ref[...] - 2.0 * xc       # (TB, TC) f32

        # Own-class mask: (TB,1) labels vs (1,TC) class ids (lane iota only).
        class_ids = ct * tc + lax.broadcasted_iota(jnp.int32, (1, tc), 1)
        own = labels_ref[...] == class_ids                     # (TB, TC) bool

        # Online reductions over the class axis.
        dist_ref[...] += jnp.sum(jnp.where(own, distmat, 0.0),
                                 axis=1, keepdims=True)
        # Padded class columns carry ||c||^2 = +inf, so they never win the min.
        dmin_ref[...] = jnp.minimum(
            dmin_ref[...],
            jnp.min(jnp.where(own, jnp.inf, distmat), axis=1, keepdims=True))

        @pl.when(ct == nct - 1)
        def _finalize():
            out_ref[...] = jnp.maximum(
                margin + w * dist_ref[...] - (1.0 - w) * dmin_ref[...], 0.0)

    return kernel


def trip_center_loss(x, centers, labels, margin, incenter_weight, *,
                     tb=512, tc=None, use_bf16_matmul=True):
    """x: (B, D) float, centers: (C, D) float, labels: (B,) int.
    margin / incenter_weight: Python floats. Returns scalar f32 loss."""
    x32 = jnp.asarray(x, jnp.float32)
    c32 = jnp.asarray(centers, jnp.float32)
    labels = jnp.asarray(labels, jnp.int32)
    B, D = x32.shape
    C = c32.shape[0]

    mm_dtype = jnp.bfloat16 if use_bf16_matmul else jnp.float32
    in_bytes = 2 if use_bf16_matmul else 4
    sub = 16 if use_bf16_matmul else 8        # sublane alignment of the x tile

    # Hoisted norms (computed once, in f32, outside the kernel).
    xsq = jnp.sum(x32 * x32, axis=1, keepdims=True)     # (B, 1)
    csq = jnp.sum(c32 * c32, axis=1)                    # (C,)

    D_pad = _round_up(D, 128)
    C128 = _round_up(C, 128)
    B8 = _round_up(B, sub)

    # ---- VMEM budget (generation aware) -------------------------------------
    try:
        vmem_phys = int(pltpu.get_tpu_info().vmem_capacity_bytes)
    except Exception:
        vmem_phys = 64 * 1024 * 1024          # conservative: v7x per-core VMEM
    vmem_limit = min(int(vmem_phys * 0.75), 100 * 1024 * 1024)
    vmem_budget = int(vmem_limit * 0.8)       # headroom for compiler temporaries

    # ---- batch tile ----------------------------------------------------------
    tb_cap = min(_round_up(max(int(tb), sub), sub), B8)
    if B8 >= 2 * sub:
        # v7x megacore: keep >= 2 batch tiles so the "parallel" axis can shard
        # across both TensorCores (harmless on 1-TC v5e/v6e).
        tb_cap = min(tb_cap, _round_up((B8 + 1) // 2, sub))
    TB = sub
    for t in range(tb_cap, sub - 1, -sub):    # prefer a TB that divides B8
        if B8 % t == 0:
            TB = t
            break
    if TB * 2 < tb_cap:                       # divisor too small: pad instead
        TB = tb_cap

    # ---- class tile ----------------------------------------------------------
    def ws(tb_, tc_):                         # double-buffered working set (bytes)
        return (2 * tb_ * D_pad * in_bytes            # x tile
                + 2 * tc_ * D_pad * in_bytes          # centers tile
                + 4 * tb_ * tc_ * 4                   # distmat / xc / mask temps
                + 2 * tc_ * 4 + 8 * tb_ * 4)          # csq, xsq, labels, out, scratch

    if tc is None:
        # Resident centers (class axis collapses to 1) whenever they fit.
        TC = C128 if ws(TB, C128) <= vmem_budget else min(512, C128)
    else:
        TC = min(_round_up(max(int(tc), 128), 128), C128)
    while TC > 128 and ws(TB, TC) > vmem_budget:
        TC -= 128
    while TB > sub and ws(TB, TC) > vmem_budget:
        TB = _round_up(TB // 2, sub)

    B_pad = _round_up(B8, TB)
    C_pad = _round_up(C128, TC)

    # ---- input prep (cast / pad in the wrapper, not in the kernel) -----------
    x_mm = x32.astype(mm_dtype)
    c_mm = c32.astype(mm_dtype)
    if D_pad != D:
        x_mm = jnp.pad(x_mm, ((0, 0), (0, D_pad - D)))
        c_mm = jnp.pad(c_mm, ((0, 0), (0, D_pad - D)))
    if B_pad != B:
        x_mm = jnp.pad(x_mm, ((0, B_pad - B), (0, 0)))
        xsq = jnp.pad(xsq, ((0, B_pad - B), (0, 0)))
        labels = jnp.pad(labels, ((0, B_pad - B),))
    c_t = c_mm.T                              # one-time (D, C) transpose in XLA
    if C_pad != C:
        c_t = jnp.pad(c_t, ((0, 0), (0, C_pad - C)))
        # +inf norm on padded classes => distmat = +inf there (xc is 0).
        csq = jnp.pad(csq, ((0, C_pad - C),), constant_values=jnp.inf)
    csq2d = csq.reshape(1, C_pad)
    labels2d = labels.reshape(B_pad, 1)

    grid = (B_pad // TB, C_pad // TC)
    precision = (lax.Precision.DEFAULT if use_bf16_matmul
                 else lax.Precision.HIGHEST)
    kernel = _make_kernel(margin=float(margin), w=float(incenter_weight),
                          tc=TC, precision=precision)

    per_row = pl.pallas_call(
        kernel,
        out_shape=jax.ShapeDtypeStruct((B_pad, 1), jnp.float32),
        grid_spec=pltpu.PrefetchScalarGridSpec(
            num_scalar_prefetch=0,
            grid=grid,
            in_specs=[
                pl.BlockSpec((TB, D_pad), lambda b, c: (b, 0)),   # x (mm dtype)
                pl.BlockSpec((D_pad, TC), lambda b, c: (0, c)),   # centers^T
                pl.BlockSpec((1, TC), lambda b, c: (0, c)),       # ||c||^2 (f32)
                pl.BlockSpec((TB, 1), lambda b, c: (b, 0)),       # ||x||^2 (f32)
                pl.BlockSpec((TB, 1), lambda b, c: (b, 0)),       # labels (i32)
            ],
            out_specs=pl.BlockSpec((TB, 1), lambda b, c: (b, 0)),
            scratch_shapes=[
                pltpu.VMEM((TB, 1), jnp.float32),   # accumulated own-class dist
                pltpu.VMEM((TB, 1), jnp.float32),   # running min over others
            ],
        ),
        compiler_params=pltpu.CompilerParams(
            dimension_semantics=("parallel", "arbitrary"),
            vmem_limit_bytes=vmem_limit,
        ),
    )(x_mm, c_t, csq2d, xsq, labels2d)

    # Padded batch rows are dropped here (no program_id needed in the kernel).
    return jnp.sum(per_row[:B, 0]) * (1.0 / B)


def trip_center_loss_ref(x, centers, labels, margin, incenter_weight):
    """Pure-JAX reference mirroring the PyTorch forward (f32, full precision)."""
    x = jnp.asarray(x, jnp.float32)
    centers = jnp.asarray(centers, jnp.float32)
    B = x.shape[0]
    C = centers.shape[0]
    distmat = (jnp.sum(x * x, axis=1, keepdims=True)
               + jnp.sum(centers * centers, axis=1)[None, :]
               - 2.0 * jnp.dot(x, centers.T, precision=lax.Precision.HIGHEST))
    mask = labels[:, None] == jnp.arange(C)[None, :]
    dist = jnp.sum(jnp.where(mask, distmat, 0.0), axis=1)
    dist_min = jnp.min(jnp.where(mask, jnp.inf, distmat), axis=1)
    return jnp.sum(jnp.maximum(
        margin + incenter_weight * dist
        - (1.0 - incenter_weight) * dist_min, 0.0)) / B


if __name__ == "__main__":
    # ---- Test 1: the module's default (tiny) shapes, exact f32 path ---------
    num_classes, feat_dim, batch = 10, 2, 8
    key = jax.random.PRNGKey(0)
    k_c, k_x, k_l = jax.random.split(key, 3)
    centers = jax.random.normal(k_c, (num_classes, feat_dim), dtype=jnp.float32)
    x = jax.random.normal(k_x, (batch, feat_dim), dtype=jnp.float32)
    labels = jax.random.randint(k_l, (batch,), 0, num_classes, dtype=jnp.int32)
    margin, incenter_weight = 1.0, 0.5

    loss = jax.block_until_ready(
        trip_center_loss(x, centers, labels, margin, incenter_weight,
                         use_bf16_matmul=False))
    ref = trip_center_loss_ref(x, centers, labels, margin, incenter_weight)
    assert jnp.allclose(loss, ref, rtol=1e-5, atol=1e-5), (loss, ref)

    # ---- Test 2: multiple batch/class tiles + padding, exact f32 path -------
    num_classes2, feat_dim2, batch2 = 300, 32, 40
    k_c2, k_x2, k_l2 = jax.random.split(jax.random.PRNGKey(1), 3)
    centers2 = jax.random.normal(k_c2, (num_classes2, feat_dim2), dtype=jnp.float32)
    x2 = jax.random.normal(k_x2, (batch2, feat_dim2), dtype=jnp.float32)
    labels2 = jax.random.randint(k_l2, (batch2,), 0, num_classes2, dtype=jnp.int32)

    loss2 = jax.block_until_ready(
        trip_center_loss(x2, centers2, labels2, 2.0, 0.4, tb=16, tc=128,
                         use_bf16_matmul=False))
    ref2 = trip_center_loss_ref(x2, centers2, labels2, 2.0, 0.4)
    assert jnp.allclose(loss2, ref2, rtol=1e-3, atol=1e-3), (loss2, ref2)

    # ---- Test 3: default fast path (bf16 MXU feed, auto tiles / resident
    # centers, >= 2 batch tiles) -----------------------------------------------
    loss3 = jax.block_until_ready(
        trip_center_loss(x2, centers2, labels2, 2.0, 0.4))
    assert jnp.allclose(loss3, ref2, rtol=5e-2, atol=1e-1), (loss3, ref2)

    print("KERNEL_OK")
</pallas_src>

<mosaic_0001>
module attributes {stable_mosaic.version = 11 : i64} {
  func.func @kernel(%arg0: i32, %arg1: i32, %arg2: memref<8x128xf32, #tpu.memory_space<vmem>>, %arg3: memref<128x128xf32, #tpu.memory_space<vmem>>, %arg4: memref<1x128xf32, #tpu.memory_space<vmem>>, %arg5: memref<8x1xf32, #tpu.memory_space<vmem>>, %arg6: memref<8x1xi32, #tpu.memory_space<vmem>>, %arg7: memref<8x1xf32, #tpu.memory_space<vmem>>, %arg8: memref<8x1xf32, #tpu.memory_space<vmem>>, %arg9: memref<8x1xf32, #tpu.memory_space<vmem>>) attributes {dimension_semantics = [#tpu.dimension_semantics<parallel>, #tpu.dimension_semantics<arbitrary>], iteration_bounds = array<i64: 1, 1>, scalar_prefetch = 0 : i64, scratch_operands = 2 : i64, tpu.core_type = #tpu.core_type<tc>, window_params = [{transform_indices = @transform_0, window_bounds = array<i64: 8, 128>}, {transform_indices = @transform_1, window_bounds = array<i64: 128, 128>}, {transform_indices = @transform_2, window_bounds = array<i64: 1, 128>}, {transform_indices = @transform_3, window_bounds = array<i64: 8, 1>}, {transform_indices = @transform_4, window_bounds = array<i64: 8, 1>}, {transform_indices = @transform_5, window_bounds = array<i64: 8, 1>}]} {
    %c0_i32 = arith.constant 0 : i32
    %0 = arith.cmpi eq, %arg1, %c0_i32 : i32
    %1 = arith.extui %0 : i1 to i32
    %c0_i32_0 = arith.constant 0 : i32
    %2 = arith.cmpi ne, %1, %c0_i32_0 : i32
    scf.if %2 {
      %cst_25 = arith.constant 0.000000e+00 : f32
      %39 = vector.broadcast %cst_25 : f32 to vector<8x1xf32>
      %c0_26 = arith.constant 0 : index
      %c0_27 = arith.constant 0 : index
      %40 = vector.load %arg8[%c0_26, %c0_27] : memref<8x1xf32, #tpu.memory_space<vmem>>, vector<8x1xf32>
      tpu.vector_store %arg8[%c0_26, %c0_27], %39 {strides = array<i32>} : memref<8x1xf32, #tpu.memory_space<vmem>>, vector<8x1xf32>,
      %cst_28 = arith.constant 0x7F800000 : f32
      %41 = vector.broadcast %cst_28 : f32 to vector<8x1xf32>
      %c0_29 = arith.constant 0 : index
      %c0_30 = arith.constant 0 : index
      %42 = vector.load %arg9[%c0_29, %c0_30] : memref<8x1xf32, #tpu.memory_space<vmem>>, vector<8x1xf32>
      tpu.vector_store %arg9[%c0_29, %c0_30], %41 {strides = array<i32>} : memref<8x1xf32, #tpu.memory_space<vmem>>, vector<8x1xf32>,
    } else {
    }
    %c0 = arith.constant 0 : index
    %c0_1 = arith.constant 0 : index
    %3 = vector.load %arg2[%c0, %c0_1] : memref<8x128xf32, #tpu.memory_space<vmem>>, vector<8x128xf32>
    %c0_2 = arith.constant 0 : index
    %c0_3 = arith.constant 0 : index
    %4 = vector.load %arg3[%c0_2, %c0_3] : memref<128x128xf32, #tpu.memory_space<vmem>>, vector<128x128xf32>
    %cst = arith.constant dense<0.000000e+00> : vector<8x128xf32>
    %5 = tpu.matmul %3, %4, %cst {dimension_numbers = #tpu.dot_dimension_numbers<[1], [0], [0], [1], [0, 0, 1, 1], [], []>, precision = #tpu.contract_precision<fp32>} : vector<8x128xf32>, vector<128x128xf32>, vector<8x128xf32> -> vector<8x128xf32>
    %c0_4 = arith.constant 0 : index
    %c0_5 = arith.constant 0 : index
    %6 = vector.load %arg5[%c0_4, %c0_5] : memref<8x1xf32, #tpu.memory_space<vmem>>, vector<8x1xf32>
    %c0_6 = arith.constant 0 : index
    %c0_7 = arith.constant 0 : index
    %7 = vector.load %arg4[%c0_6, %c0_7] : memref<1x128xf32, #tpu.memory_space<vmem>>, vector<1x128xf32>
    %8 = vector.broadcast %6 : vector<8x1xf32> to vector<8x128xf32>
    %9 = vector.broadcast %7 : vector<1x128xf32> to vector<8x128xf32>
    %10 = arith.addf %8, %9 : vector<8x128xf32>
    %cst_8 = arith.constant 2.000000e+00 : f32
    %11 = vector.broadcast %cst_8 : f32 to vector<8x128xf32>
    %12 = arith.mulf %11, %5 : vector<8x128xf32>
    %13 = arith.subf %10, %12 : vector<8x128xf32>
    %c128_i32 = arith.constant 128 : i32
    %14 = arith.muli %arg1, %c128_i32 : i32
    %15 = tpu.iota {dimensions = array<i32: 1>} : vector<1x128xi32>
    %16 = vector.broadcast %14 : i32 to vector<1x128xi32>
    %17 = arith.addi %16, %15 : vector<1x128xi32>
    %c0_9 = arith.constant 0 : index
    %c0_10 = arith.constant 0 : index
    %18 = vector.load %arg6[%c0_9, %c0_10] : memref<8x1xi32, #tpu.memory_space<vmem>>, vector<8x1xi32>
    %19 = vector.broadcast %18 : vector<8x1xi32> to vector<8x128xi32>
    %20 = vector.broadcast %17 : vector<1x128xi32> to vector<8x128xi32>
    %21 = arith.cmpi eq, %19, %20 : vector<8x128xi32>
    %c0_11 = arith.constant 0 : index
    %c0_12 = arith.constant 0 : index
    %22 = vector.load %arg8[%c0_11, %c0_12] : memref<8x1xf32, #tpu.memory_space<vmem>>, vector<8x1xf32>
    %cst_13 = arith.constant 0.000000e+00 : f32
    %23 = vector.broadcast %cst_13 : f32 to vector<8x128xf32>
    %24 = arith.select %21, %13, %23 : vector<8x128xi1>, vector<8x128xf32>
    %cst_14 = arith.constant dense<0.000000e+00> : vector<8xf32>
    %25 = vector.multi_reduction <add>, %24, %cst_14 [1] : vector<8x128xf32> to vector<8xf32>
    %26 = vector.shape_cast %25 : vector<8xf32> to vector<8x1xf32>
    %27 = arith.addf %22, %26 : vector<8x1xf32>
    %c0_15 = arith.constant 0 : index
    %c0_16 = arith.constant 0 : index
    %28 = vector.load %arg8[%c0_15, %c0_16] : memref<8x1xf32, #tpu.memory_space<vmem>>, vector<8x1xf32>
    tpu.vector_store %arg8[%c0_15, %c0_16], %27 {strides = array<i32>} : memref<8x1xf32, #tpu.memory_space<vmem>>, vector<8x1xf32>,
    %c0_17 = arith.constant 0 : index
    %c0_18 = arith.constant 0 : index
    %29 = vector.load %arg9[%c0_17, %c0_18] : memref<8x1xf32, #tpu.memory_space<vmem>>, vector<8x1xf32>
    %cst_19 = arith.constant 0x7F800000 : f32
    %30 = vector.broadcast %cst_19 : f32 to vector<8x128xf32>
    %31 = arith.select %21, %30, %13 : vector<8x128xi1>, vector<8x128xf32>
    %cst_20 = arith.constant dense<0x7F800000> : vector<8xf32>
    %32 = vector.multi_reduction <minimumf>, %31, %cst_20 [1] : vector<8x128xf32> to vector<8xf32>
    %33 = vector.shape_cast %32 : vector<8xf32> to vector<8x1xf32>
    %34 = arith.minimumf %29, %33 : vector<8x1xf32>
    %c0_21 = arith.constant 0 : index
    %c0_22 = arith.constant 0 : index
    %35 = vector.load %arg9[%c0_21, %c0_22] : memref<8x1xf32, #tpu.memory_space<vmem>>, vector<8x1xf32>
    tpu.vector_store %arg9[%c0_21, %c0_22], %34 {strides = array<i32>} : memref<8x1xf32, #tpu.memory_space<vmem>>, vector<8x1xf32>,
    %c0_i32_23 = arith.constant 0 : i32
    %36 = arith.cmpi eq, %arg1, %c0_i32_23 : i32
    %37 = arith.extui %36 : i1 to i32
    %c0_i32_24 = arith.constant 0 : i32
    %38 = arith.cmpi ne, %37, %c0_i32_24 : i32
    scf.if %38 {
      %c0_25 = arith.constant 0 : index
      %c0_26 = arith.constant 0 : index
      %39 = vector.load %arg8[%c0_25, %c0_26] : memref<8x1xf32, #tpu.memory_space<vmem>>, vector<8x1xf32>
      %cst_27 = arith.constant 5.000000e-01 : f32
      %40 = vector.broadcast %cst_27 : f32 to vector<8x1xf32>
      %41 = arith.mulf %40, %39 : vector<8x1xf32>
      %cst_28 = arith.constant 1.000000e+00 : f32
      %42 = vector.broadcast %cst_28 : f32 to vector<8x1xf32>
      %43 = arith.addf %42, %41 : vector<8x1xf32>
      %c0_29 = arith.constant 0 : index
      %c0_30 = arith.constant 0 : index
      %44 = vector.load %arg9[%c0_29, %c0_30] : memref<8x1xf32, #tpu.memory_space<vmem>>, vector<8x1xf32>
      %cst_31 = arith.constant 5.000000e-01 : f32
      %45 = vector.broadcast %cst_31 : f32 to vector<8x1xf32>
      %46 = arith.mulf %45, %44 : vector<8x1xf32>
      %47 = arith.subf %43, %46 : vector<8x1xf32>
      %cst_32 = arith.constant 0.000000e+00 : f32
      %48 = vector.broadcast %cst_32 : f32 to vector<8x1xf32>
      %49 = arith.maximumf %47, %48 : vector<8x1xf32>
      %c0_33 = arith.constant 0 : index
      %c0_34 = arith.constant 0 : index
      %50 = vector.load %arg7[%c0_33, %c0_34] : memref<8x1xf32, #tpu.memory_space<vmem>>, vector<8x1xf32>
      tpu.vector_store %arg7[%c0_33, %c0_34], %49 {strides = array<i32>} : memref<8x1xf32, #tpu.memory_space<vmem>>, vector<8x1xf32>,
    } else {
    }
    return
  }
  func.func @transform_0(%arg0: i32, %arg1: i32) -> (i32, i32) {
    %c0_i32 = arith.constant 0 : i32
    %c0_i32_0 = arith.constant 0 : i32
    return %arg0, %c0_i32 : i32, i32
  }
  func.func @transform_1(%arg0: i32, %arg1: i32) -> (i32, i32) {
    %c0_i32 = arith.constant 0 : i32
    %c0_i32_0 = arith.constant 0 : i32
    return %c0_i32, %arg1 : i32, i32
  }
  func.func @transform_2(%arg0: i32, %arg1: i32) -> (i32, i32) {
    %c0_i32 = arith.constant 0 : i32
    %c0_i32_0 = arith.constant 0 : i32
    return %c0_i32, %arg1 : i32, i32
  }
  func.func @transform_3(%arg0: i32, %arg1: i32) -> (i32, i32) {
    %c0_i32 = arith.constant 0 : i32
    %c0_i32_0 = arith.constant 0 : i32
    return %arg0, %c0_i32 : i32, i32
  }
  func.func @transform_4(%arg0: i32, %arg1: i32) -> (i32, i32) {
    %c0_i32 = arith.constant 0 : i32
    %c0_i32_0 = arith.constant 0 : i32
    return %arg0, %c0_i32 : i32, i32
  }
  func.func @transform_5(%arg0: i32, %arg1: i32) -> (i32, i32) {
    %c0_i32 = arith.constant 0 : i32
    %c0_i32_0 = arith.constant 0 : i32
    return %arg0, %c0_i32 : i32, i32
  }
}

</mosaic_0001>

<bundles_post_ra>
// kernel: tpu_custom_call.1
= control target key start
LH: loop header
LB: loop body
LE: loop exit
PB: predicated region body
PF: predicated region fallthrough
CT: control target
= control target key end

     0   :  { %10 = vsyncpa [#allocation5], 0  ;;  %s1097_s18 = smov [#allocation4]   ;;  %s1521_s0 = inlined_call_operand.vmem [shape: f32[8,128], index: 0, kind: input, shape index: {}]   ;;  %s1522_s1 = inlined_call_operand.hbm [shape: f32[128,128], index: 1, kind: input, shape index: {}]   ;;  %s1523_s2 = inlined_call_operand.vmem [shape: f32[1,128], index: 2, kind: input, shape index: {}]   ;;  %s1524_s3 = inlined_call_operand.vmem [shape: f32[8,1], index: 3, kind: input, shape index: {}]   ;;  %s1525_s4 = inlined_call_operand.vmem [shape: s32[8,1], index: 4, kind: input, shape index: {}]   ;;  %s1526_s5 = inlined_call_operand.vmem [shape: f32[8,1], index: 5, kind: output, shape index: {}]  }
   0x1   :  { %s18_s19 = sshll.u32 %s1097_s18, 4  ;;  %s19_s19 = int_to_ptr.vmem [resolvable:$true] %s18_s19 }
   0x2   :  { %s1083_s20 = scalar_lea.vmem %s19_s19, 2048  ;;  %p1088_p1 = scmp.lt.s32.totalorder %s19_s19, %s19_s19 }
   0x3   :  { %p1084_p0 = scmp.ne.s32.totalorder %s19_s19, %s1083_s20  ;;  %p1089_p2 = scmp.lt.s32.totalorder %s1083_s20, %s1083_s20 }
   0x5   :  { %p1090_p3 = por %p1089_p2, %p1088_p1 }
   0x7   :  { %p1091_p4 = pnand %p1090_p3, %p1084_p0 }
   0x9   :  { %1094 = shalt.err (!%p1091_p4)
}
   0xa   :  { %s1098_s21 = smov 128   ;;  %s1099_s22 = smov 8  }
   0xb   :  { %24 = dma.hbm_to_vmem [thread:$0]  %s1522_s1, 2048, %s19_s19, [#allocation5], %s1098_s21, %s1098_s21, %s1099_s22  }
   0xc   :  { %1095 = dma.done.wait [#allocation5], 2048  }
   0xd   :  { %1096 = vsyncadd [#allocation5], 4294965248  ;;  %v1100_v0 = vmov 0.0   ;;  %vm1101_vm0 = vmmov 0   ;;  %v1102_v1 = vmov 0   ;;  %v57_v2 = vld [vmem:[#allocation4 + $0x78] sm:$0xff] }
   0xe   :  { %857 = vmatprep.subr.mxu0 %v1100_v0  ;;  %892 = vmatprep.subr.mxu1 %v1100_v0  ;;  %v56_v3 = vld [vmem:[#allocation4 + $0x70] sm:$0xff]  ;;  %v55_v4 = vld [vmem:[#allocation4 + $0x68] sm:$0xff]  ;;  %v1143_v5 = vand.u32 4294901760, %v57_v2  ;;  %v54_v8 = vld [vmem:[#allocation4 + $0x60] sm:$0xff]  ;;  %vm38_vm1 = vcmask 7168  }
   0xf   :  { %889 = vmatprep.mubr.msk.f32.mxu0 %vm1101_vm0, %v1100_v0  ;;  %924 = vmatprep.mubr.msk.f32.mxu1 %vm1101_vm0, %v1100_v0  ;;  %v1145_v6 = vand.u32 4294901760, %v56_v3  ;;  %v1147_v7 = vand.u32 4294901760, %v55_v4  ;;  %v53_v9 = vld [vmem:[#allocation4 + $0x58] sm:$0xff]  ;;  %v52_v10 = vld [vmem:[#allocation4 + $0x50] sm:$0xff]  ;;  %v1149_v11 = vand.u32 4294901760, %v54_v8  ;;  %v51_v14 = vld [vmem:[#allocation4 + $0x48] sm:$0xff] }
  0x10   :  { %1074 = vset.pattern.permute.xlu0 %v1102_v1  ;;  %v1151_v12 = vand.u32 4294901760, %v53_v9  ;;  %v1153_v13 = vand.u32 4294901760, %v52_v10  ;;  %v50_v15 = vld [vmem:[#allocation4 + $0x40] sm:$0xff]  ;;  %858 = vmatpush3.msra.mxu0 %v1143_v5  ;;  %v1157_v16 = vsub.f32 %v57_v2, %v1143_v5  ;;  %v1162_v18 = vand.u32 4294901760, %v51_v14  ;;  %v49_v20 = vld [vmem:[#allocation4 + $0x38] sm:$0xff]  ;;  %v48_v27 = vld [vmem:[#allocation4 + $0x30] sm:$0xff] }
  0x11   :  { %v1160_v17 = vsub.f32 %v56_v3, %v1145_v6  ;;  %v1165_v19 = vsub.f32 %v55_v4, %v1147_v7  ;;  %859 = vmatprep.subr.mxu0 %v1100_v0  ;;  %v1169_v21 = vsub.f32 %v54_v8, %v1149_v11  ;;  %v1178_v26 = vand.u32 4294901760, %v50_v15  ;;  %v699_v32 = vld [vmem:[%s1524_s3] sm:$0xff]  ;;  %v47_v38 = vld [vmem:[#allocation4 + $0x28] sm:$0xff]  ;;  %v46_v43 = vld [vmem:[#allocation4 + $0x20] sm:$0xff]  ;;  %39 = vst.msk [vmem:[#allocation2] sm:$0xff] %vm38_vm1, %v1100_v0 }
  0x12   :  { %v1172_v22 = vsub.f32 %v53_v9, %v1151_v12  ;;  %860 = vmatpush3.msra.mxu0 %v1145_v6  ;;  %v152_v23 = vand.u32 4294901760, %v1157_v16  ;;  %v1182_v29 = vand.u32 4294901760, %v49_v20  ;;  %v1186_v31 = vsub.f32 %v52_v10, %v1153_v13  ;;  %703 = vperm.xlu0 %1074, %v699_v32   ;;  %v45_v51 = vld [vmem:[#allocation4 + $0x18] sm:$0xff]  ;;  %v41_v52 = vld [vmem:[%s1521_s0] sm:$0xff]  ;;  %v43_v62 = vld [vmem:[#allocation4 + $0x8] sm:$0xff] }
  0x13   :  { %v159_v24 = vand.u32 4294901760, %v1160_v17  ;;  %v166_v25 = vand.u32 4294901760, %v1165_v19  ;;  %861 = vmatprep.subr.mxu0 %v1100_v0  ;;  %v173_v28 = vand.u32 4294901760, %v1169_v21  ;;  %v1202_v36 = vsub.f32 %v51_v14, %v1162_v18  ;;  %v44_v56 = vld [vmem:[#allocation4 + $0x10] sm:$0xff]  ;;  %v42_v9 = vld [vmem:[#allocation4] sm:$0xff] }
  0x14   :  { %v180_v30 = vand.u32 4294901760, %v1172_v22  ;;  %862 = vmatpush3.msra.mxu0 %v1147_v7  ;;  %v153_v33 = vsub.f32 %v1157_v16, %v152_v23  ;;  %v1205_v37 = vand.u32 4294901760, %v48_v27  ;;  %v187_v42 = vand.u32 4294901760, %v1186_v31 }
  0x15   :  { %v160_v34 = vsub.f32 %v1160_v17, %v159_v24  ;;  %v167_v35 = vsub.f32 %v1165_v19, %v166_v25  ;;  %863 = vmatprep.subr.mxu0 %v1100_v0  ;;  %v174_v41 = vsub.f32 %v1169_v21, %v173_v28  ;;  %v1217_v45 = vsub.f32 %v50_v15, %v1178_v26 }
  0x16   :  { %864 = vmatpush3.msra.mxu0 %v1149_v11  ;;  %v154_v39 = vand.u32 4294901760, %v153_v33  ;;  %v181_v44 = vsub.f32 %v1172_v22, %v180_v30  ;;  %v1220_v47 = vand.u32 4294901760, %v47_v38  ;;  %v194_v48 = vand.u32 4294901760, %v1202_v36 }
  0x17   :  { %v161_v40 = vand.u32 4294901760, %v160_v34  ;;  %865 = vmatprep.subr.mxu0 %v1100_v0  ;;  %v168_v46 = vand.u32 4294901760, %v167_v35  ;;  %v1224_v49 = vsub.f32 %v49_v20, %v1182_v29  ;;  %v1228_v50 = vand.u32 4294901760, %v46_v43 }
  0x18   :  { %866 = vmatpush3.msra.mxu0 %v1151_v12  ;;  %893 = vmatpush3.msra.mxu1 %v154_v39  ;;  %v175_v53 = vand.u32 4294901760, %v174_v41  ;;  %v188_v54 = vsub.f32 %v1186_v31, %v187_v42  ;;  %v201_v55 = vand.u32 4294901760, %v1217_v45  ;;  %v1239_v57 = vsub.f32 %v48_v27, %v1205_v37 }
  0x19   :  { %867 = vmatprep.subr.mxu0 %v1100_v0  ;;  %894 = vmatprep.subr.mxu1 %v1100_v0  ;;  %v182_v58 = vand.u32 4294901760, %v181_v44  ;;  %v208_v59 = vand.u32 4294901760, %v1224_v49  ;;  %v195_v60 = vsub.f32 %v1202_v36, %v194_v48  ;;  %v1248_v61 = vand.u32 4294901760, %v45_v51 }
  0x1a   :  { %868 = vmatpush3.msra.mxu0 %v1153_v13  ;;  %895 = vmatpush3.msra.mxu1 %v161_v40  ;;  %v1251_v63 = vsub.f32 %v47_v38, %v1220_v47  ;;  %v1253_v1 = vand.u32 4294901760, %v41_v52  ;;  %v1257_v2 = vand.u32 4294901760, %v44_v56  ;;  %v189_v3 = vand.u32 4294901760, %v188_v54 }
  0x1b   :  { %869 = vmatprep.subr.mxu0 %v1100_v0  ;;  %896 = vmatprep.subr.mxu1 %v1100_v0  ;;  %v202_v4 = vsub.f32 %v1217_v45, %v201_v55  ;;  %v215_v8 = vand.u32 4294901760, %v1239_v57  ;;  %v1265_v10 = vsub.f32 %v46_v43, %v1228_v50  ;;  %v209_v14 = vsub.f32 %v1224_v49, %v208_v59 }
  0x1c   :  { %870 = vmatpush3.msra.mxu0 %v1162_v18  ;;  %897 = vmatpush3.msra.mxu1 %v168_v46  ;;  %v1272_v15 = vand.u32 4294901760, %v43_v62  ;;  %v196_v20 = vand.u32 4294901760, %v195_v60  ;;  %v222_v27 = vand.u32 4294901760, %v1251_v63  ;;  %v1277_v32 = vsub.f32 %v41_v52, %v1253_v1 }
  0x1d   :  { %871 = vmatprep.subr.mxu0 %v1100_v0  ;;  %898 = vmatprep.subr.mxu1 %v1100_v0  ;;  %v1280_v33 = vsub.f32 %v45_v51, %v1248_v61  ;;  %v1284_v34 = vand.u32 4294901760, %v42_v9  ;;  %v203_v35 = vand.u32 4294901760, %v202_v4  ;;  %v216_v38 = vsub.f32 %v1239_v57, %v215_v8 }
  0x1e   :  { %872 = vmatpush3.msra.mxu0 %v1178_v26  ;;  %899 = vmatpush3.msra.mxu1 %v175_v53  ;;  %v229_v39 = vand.u32 4294901760, %v1265_v10  ;;  %v1292_v40 = vsub.f32 %v44_v56, %v1257_v2  ;;  %v210_v41 = vand.u32 4294901760, %v209_v14  ;;  %v223_v43 = vsub.f32 %v1251_v63, %v222_v27 }
  0x1f   :  { %873 = vmatprep.subr.mxu0 %v1100_v0  ;;  %900 = vmatprep.subr.mxu1 %v1100_v0  ;;  %v141_v44 = vand.u32 4294901760, %v1277_v32  ;;  %v236_v46 = vand.u32 4294901760, %v1280_v33  ;;  %v1303_v51 = vsub.f32 %v43_v62, %v1272_v15  ;;  %v217_v52 = vand.u32 4294901760, %v216_v38 }
  0x20   :  { %874 = vmatpush3.msra.mxu0 %v1182_v29  ;;  %901 = vmatpush3.msra.mxu1 %v182_v58  ;;  %v230_v53 = vsub.f32 %v1265_v10, %v229_v39  ;;  %v243_v54 = vand.u32 4294901760, %v1292_v40  ;;  %v1313_v56 = vsub.f32 %v42_v9, %v1284_v34  ;;  %v224_v58 = vand.u32 4294901760, %v223_v43 }
  0x21   :  { %875 = vmatprep.subr.mxu0 %v1100_v0  ;;  %902 = vmatprep.subr.mxu1 %v1100_v0  ;;  %v142_v60 = vsub.f32 %v1277_v32, %v141_v44  ;;  %v237_v62 = vsub.f32 %v1280_v33, %v236_v46 }
  0x22   :  { %876 = vmatpush3.msra.mxu0 %v1205_v37  ;;  %903 = vmatpush3.msra.mxu1 %v189_v3  ;;  %v250_v3 = vand.u32 4294901760, %v1303_v51  ;;  %v231_v4 = vand.u32 4294901760, %v230_v53  ;;  %v244_v9 = vsub.f32 %v1292_v40, %v243_v54  ;;  %v257_v14 = vand.u32 4294901760, %v1313_v56 }
  0x23   :  { %877 = vmatprep.subr.mxu0 %v1100_v0  ;;  %904 = vmatprep.subr.mxu1 %v1100_v0 }
  0x24   :  { %878 = vmatpush3.msra.mxu0 %v1220_v47  ;;  %905 = vmatpush3.msra.mxu1 %v196_v20  ;;  %v143_v20 = vand.u32 4294901760, %v142_v60  ;;  %v251_v38 = vsub.f32 %v1303_v51, %v250_v3  ;;  %v258_v43 = vsub.f32 %v1313_v56, %v257_v14 }
  0x25   :  { %879 = vmatprep.subr.mxu0 %v1100_v0  ;;  %906 = vmatprep.subr.mxu1 %v1100_v0 }
  0x26   :  { %880 = vmatpush3.msra.mxu0 %v1228_v50  ;;  %907 = vmatpush3.msra.mxu1 %v203_v35  ;;  %v238_v35 = vand.u32 4294901760, %v237_v62  ;;  %v259_v53 = vand.u32 4294901760, %v258_v43 }
  0x27   :  { %881 = vmatprep.subr.mxu0 %v1100_v0  ;;  %908 = vmatprep.subr.mxu1 %v1100_v0 }
  0x28   :  { %882 = vmatpush3.msra.mxu0 %v1248_v61  ;;  %909 = vmatpush3.msra.mxu1 %v210_v41  ;;  %v245_v41 = vand.u32 4294901760, %v244_v9 }
  0x29   :  { %883 = vmatprep.subr.mxu0 %v1100_v0  ;;  %910 = vmatprep.subr.mxu1 %v1100_v0 }
  0x2a   :  { %884 = vmatpush3.msra.mxu0 %v1257_v2  ;;  %911 = vmatpush3.msra.mxu1 %v217_v52  ;;  %v252_v52 = vand.u32 4294901760, %v251_v38 }
  0x2b   :  { %885 = vmatprep.subr.mxu0 %v1100_v0  ;;  %912 = vmatprep.subr.mxu1 %v1100_v0 }
  0x2c   :  { %886 = vmatpush3.msra.mxu0 %v1272_v15  ;;  %913 = vmatpush3.msra.mxu1 %v224_v58 }
  0x2d   :  { %887 = vmatprep.subr.mxu0 %v1100_v0  ;;  %914 = vmatprep.subr.mxu1 %v1100_v0 }
  0x2e   :  { %888 = vmatpush3.msra.mxu0 %v1284_v34  ;;  %915 = vmatpush3.msra.mxu1 %v231_v4 }
  0x2f   :  { %916 = vmatprep.subr.mxu1 %v1100_v0  ;;  %927 = vmatprep.subr.mxu0 %v1100_v0 }
  0x30   :  { %890 = vmatmul.mubr.f32.vlgmr.msra.gmra.mxu0 %v143_v20  ;;  %917 = vmatpush3.msra.mxu1 %v238_v35 }
  0x31   :  { %928 = vmatpush3.msra.mxu0 %v1157_v16  ;;  %918 = vmatprep.subr.mxu1 %v1100_v0 }
  0x32   :  { %929 = vmatprep.subr.mxu0 %v1100_v0  ;;  %919 = vmatpush3.msra.mxu1 %v245_v41 }
  0x33   :  { %930 = vmatpush3.msra.mxu0 %v1160_v17  ;;  %920 = vmatprep.subr.mxu1 %v1100_v0 }
  0x34   :  { %931 = vmatprep.subr.mxu0 %v1100_v0  ;;  %921 = vmatpush3.msra.mxu1 %v252_v52 }
  0x35   :  { %932 = vmatpush3.msra.mxu0 %v1165_v19  ;;  %922 = vmatprep.subr.mxu1 %v1100_v0 }
  0x36   :  { %933 = vmatprep.subr.mxu0 %v1100_v0  ;;  %923 = vmatpush3.msra.mxu1 %v259_v53 }
  0x37   :  { %934 = vmatpush3.msra.mxu0 %v1169_v21  ;;  %925 = vmatmul.mubr.f32.vlgmr.msra.gmra.mxu1 %v1253_v1 }
  0x38   :  { %935 = vmatprep.subr.mxu0 %v1100_v0  ;;  %962 = vmatprep.subr.mxu1 %v1100_v0 }
  0x39   :  { %936 = vmatpush3.msra.mxu0 %v1172_v22  ;;  %963 = vmatpush3.msra.mxu1 %v1143_v5 }
  0x3a   :  { %937 = vmatprep.subr.mxu0 %v1100_v0  ;;  %964 = vmatprep.subr.mxu1 %v1100_v0 }
  0x3b   :  { %938 = vmatpush3.msra.mxu0 %v1186_v31  ;;  %965 = vmatpush3.msra.mxu1 %v1145_v6 }
  0x3c   :  { %939 = vmatprep.subr.mxu0 %v1100_v0  ;;  %966 = vmatprep.subr.mxu1 %v1100_v0 }
  0x3d   :  { %940 = vmatpush3.msra.mxu0 %v1202_v36  ;;  %967 = vmatpush3.msra.mxu1 %v1147_v7 }
  0x3e   :  { %941 = vmatprep.subr.mxu0 %v1100_v0  ;;  %968 = vmatprep.subr.mxu1 %v1100_v0 }
  0x3f   :  { %942 = vmatpush3.msra.mxu0 %v1217_v45  ;;  %969 = vmatpush3.msra.mxu1 %v1149_v11 }
  0x40   :  { %943 = vmatprep.subr.mxu0 %v1100_v0  ;;  %970 = vmatprep.subr.mxu1 %v1100_v0 }
  0x41   :  { %944 = vmatpush3.msra.mxu0 %v1224_v49  ;;  %971 = vmatpush3.msra.mxu1 %v1151_v12 }
  0x42   :  { %945 = vmatprep.subr.mxu0 %v1100_v0  ;;  %972 = vmatprep.subr.mxu1 %v1100_v0 }
  0x43   :  { %946 = vmatpush3.msra.mxu0 %v1239_v57  ;;  %973 = vmatpush3.msra.mxu1 %v1153_v13 }
  0x44   :  { %947 = vmatprep.subr.mxu0 %v1100_v0  ;;  %974 = vmatprep.subr.mxu1 %v1100_v0 }
  0x45   :  { %948 = vmatpush3.msra.mxu0 %v1251_v63  ;;  %975 = vmatpush3.msra.mxu1 %v1162_v18 }
  0x46   :  { %949 = vmatprep.subr.mxu0 %v1100_v0  ;;  %976 = vmatprep.subr.mxu1 %v1100_v0 }
  0x47   :  { %950 = vmatpush3.msra.mxu0 %v1265_v10  ;;  %977 = vmatpush3.msra.mxu1 %v1178_v26 }
  0x48   :  { %951 = vmatprep.subr.mxu0 %v1100_v0  ;;  %978 = vmatprep.subr.mxu1 %v1100_v0 }
  0x49   :  { %952 = vmatpush3.msra.mxu0 %v1280_v33  ;;  %979 = vmatpush3.msra.mxu1 %v1182_v29 }
  0x4a   :  { %953 = vmatprep.subr.mxu0 %v1100_v0  ;;  %980 = vmatprep.subr.mxu1 %v1100_v0 }
  0x4b   :  { %954 = vmatpush3.msra.mxu0 %v1292_v40  ;;  %981 = vmatpush3.msra.mxu1 %v1205_v37 }
  0x4c   :  { %955 = vmatprep.subr.mxu0 %v1100_v0  ;;  %982 = vmatprep.subr.mxu1 %v1100_v0 }
  0x4d   :  { %956 = vmatpush3.msra.mxu0 %v1303_v51  ;;  %983 = vmatpush3.msra.mxu1 %v1220_v47 }
  0x4e   :  { %957 = vmatprep.subr.mxu0 %v1100_v0  ;;  %984 = vmatprep.subr.mxu1 %v1100_v0 }
  0x4f   :  { %958 = vmatpush3.msra.mxu0 %v1313_v56  ;;  %959 = vmatprep.mubr.msk.f32.mxu0 %vm1101_vm0, %v1100_v0 }
  0x50   :  { %985 = vmatpush3.msra.mxu1 %v1228_v50  ;;  %960 = vmatmul.mubr.f32.vlgmr.msra.gmra.mxu0 %v1277_v32 }
  0x51   :  { %986 = vmatprep.subr.mxu1 %v1100_v0  ;;  %997 = vmatprep.subr.mxu0 %v1100_v0 }
  0x52   :  { %987 = vmatpush3.msra.mxu1 %v1248_v61  ;;  %998 = vmatpush3.msra.mxu0 %v152_v23 }
  0x53   :  { %988 = vmatprep.subr.mxu1 %v1100_v0  ;;  %999 = vmatprep.subr.mxu0 %v1100_v0 }
  0x54   :  { %989 = vmatpush3.msra.mxu1 %v1257_v2  ;;  %1000 = vmatpush3.msra.mxu0 %v159_v24 }
  0x55   :  { %990 = vmatprep.subr.mxu1 %v1100_v0  ;;  %1001 = vmatprep.subr.mxu0 %v1100_v0 }
  0x56   :  { %991 = vmatpush3.msra.mxu1 %v1272_v15  ;;  %1002 = vmatpush3.msra.mxu0 %v166_v25 }
  0x57   :  { %992 = vmatprep.subr.mxu1 %v1100_v0  ;;  %1003 = vmatprep.subr.mxu0 %v1100_v0 }
  0x58   :  { %993 = vmatpush3.msra.mxu1 %v1284_v34  ;;  %994 = vmatprep.mubr.msk.f32.mxu1 %vm1101_vm0, %v1100_v0 }
  0x59   :  { %1004 = vmatpush3.msra.mxu0 %v173_v28  ;;  %995 = vmatmul.mubr.f32.vlgmr.msra.gmra.mxu1 %v141_v44  ;;  %v716_v28 = vlaneseq }
  0x5a   :  { %1005 = vmatprep.subr.mxu0 %v1100_v0  ;;  %1032 = vmatprep.subr.mxu1 %v1100_v0 }
  0x5b   :  { %1006 = vmatpush3.msra.mxu0 %v180_v30  ;;  %1033 = vmatpush3.msra.mxu1 %v1143_v5  ;;  %v720_v5 = vld [vmem:[%s1525_s4] sm:$0xff]  ;;  %v717_v36 = vand.u32 127, %v716_v28 }
  0x5c   :  { %1007 = vmatprep.subr.mxu0 %v1100_v0  ;;  %1034 = vmatprep.subr.mxu1 %v1100_v0 }
  0x5d   :  { %1008 = vmatpush3.msra.mxu0 %v187_v42  ;;  %1035 = vmatpush3.msra.mxu1 %v1145_v6 }
  0x5e   :  { %1009 = vmatprep.subr.mxu0 %v1100_v0  ;;  %1036 = vmatprep.subr.mxu1 %v1100_v0 }
  0x5f   :  { %1010 = vmatpush3.msra.mxu0 %v194_v48  ;;  %1037 = vmatpush3.msra.mxu1 %v1147_v7 }
  0x60   :  { %1011 = vmatprep.subr.mxu0 %v1100_v0  ;;  %1038 = vmatprep.subr.mxu1 %v1100_v0 }
  0x61   :  { %1012 = vmatpush3.msra.mxu0 %v201_v55  ;;  %1039 = vmatpush3.msra.mxu1 %v1149_v11  ;;  %v725_v55 = vld [vmem:[#allocation2] sm:$0xff] }
  0x62   :  { %1013 = vmatprep.subr.mxu0 %v1100_v0  ;;  %1040 = vmatprep.subr.mxu1 %v1100_v0 }
  0x63   :  { %1014 = vmatpush3.msra.mxu0 %v208_v59  ;;  %1041 = vmatpush3.msra.mxu1 %v1151_v12 }
  0x64   :  { %1015 = vmatprep.subr.mxu0 %v1100_v0  ;;  %1042 = vmatprep.subr.mxu1 %v1100_v0 }
  0x65   :  { %1016 = vmatpush3.msra.mxu0 %v215_v8  ;;  %1043 = vmatpush3.msra.mxu1 %v1153_v13 }
  0x66   :  { %1017 = vmatprep.subr.mxu0 %v1100_v0  ;;  %1044 = vmatprep.subr.mxu1 %v1100_v0 }
  0x67   :  { %1018 = vmatpush3.msra.mxu0 %v222_v27  ;;  %1045 = vmatpush3.msra.mxu1 %v1162_v18 }
  0x68   :  { %1019 = vmatprep.subr.mxu0 %v1100_v0  ;;  %1046 = vmatprep.subr.mxu1 %v1100_v0 }
  0x69   :  { %1020 = vmatpush3.msra.mxu0 %v229_v39  ;;  %1047 = vmatpush3.msra.mxu1 %v1178_v26  ;;  %v754_v26 = vld [vmem:[%s1523_s2] ss:$0 sm:$0xff] }
  0x6a   :  { %1021 = vmatprep.subr.mxu0 %v1100_v0  ;;  %1048 = vmatprep.subr.mxu1 %v1100_v0 }
  0x6b   :  { %1022 = vmatpush3.msra.mxu0 %v236_v46  ;;  %1049 = vmatpush3.msra.mxu1 %v1182_v29 }
  0x6c   :  { %1023 = vmatprep.subr.mxu0 %v1100_v0  ;;  %1050 = vmatprep.subr.mxu1 %v1100_v0 }
  0x6d   :  { %1024 = vmatpush3.msra.mxu0 %v243_v54  ;;  %1051 = vmatpush3.msra.mxu1 %v1205_v37 }
  0x6e   :  { %1025 = vmatprep.subr.mxu0 %v1100_v0  ;;  %1052 = vmatprep.subr.mxu1 %v1100_v0 }
  0x6f   :  { %1026 = vmatpush3.msra.mxu0 %v250_v3  ;;  %1053 = vmatpush3.msra.mxu1 %v1220_v47 }
  0x70   :  { %1027 = vmatprep.subr.mxu0 %v1100_v0  ;;  %1054 = vmatprep.subr.mxu1 %v1100_v0 }
  0x71   :  { %1028 = vmatpush3.msra.mxu0 %v257_v14  ;;  %1029 = vmatprep.mubr.msk.f32.mxu0 %vm1101_vm0, %v1100_v0 }
  0x72   :  { %1055 = vmatpush3.msra.mxu1 %v1228_v50  ;;  %1030 = vmatmul.mubr.f32.vlgmr.msra.gmra.mxu0 %v1253_v1  ;;  %v1103_v50 = vmov inf  }
  0x73   :  { %1056 = vmatprep.subr.mxu1 %v1100_v0  ;;  %1064 = vmatprep.mubr.msk.f32.mxu1 %vm1101_vm0, %v1100_v0  ;;  %40 = vst.msk [vmem:[#allocation3] sm:$0xff] %vm38_vm1, %v1103_v50 }
  0x74   :  { %1057 = vmatpush3.msra.mxu1 %v1248_v61  ;;  %722 = vperm.xlu0 %1074, %v720_v5  }
  0x75   :  { %1058 = vmatprep.subr.mxu1 %v1100_v0 }
  0x76   :  { %1059 = vmatpush3.msra.mxu1 %v1257_v2 }
  0x77   :  { %1060 = vmatprep.subr.mxu1 %v1100_v0 }
  0x78   :  { %1061 = vmatpush3.msra.mxu1 %v1272_v15 }
  0x79   :  { %1062 = vmatprep.subr.mxu1 %v1100_v0 }
  0x7a   :  { %1063 = vmatpush3.msra.mxu1 %v1284_v34  ;;  %v732_v61 = vld [vmem:[#allocation3] sm:$0xff] }
  0x7b   :  { %1065 = vmatmul.mubr.f32.vlgmr.msra.gmra.mxu1 %v1253_v1 }
  0x8d   :  { %v704_v25 = vpop.permute.xlu0 %703 }
  0x8e   :  { %v712_v30 = vadd.f32 %v754_v26, %v704_v25 }
  0xef   :  { %v723_v45 = vpop.permute.xlu0 %722 }
  0xf0   :  { %v145_v6 = vpop.f32.mrf.mxu0  ;;  %vm724_vm2 = vcmp.eq.s32.totalorder %v723_v45, %v717_v36 }
  0xf2   :  { %v891_v7 = vpop.f32.mrf.mxu0 }
  0xf7   :  { %v296_v11 = vpop.f32.mrf.mxu1 }
  0xf8   :  { %v297_v21 = vadd.f32 %v296_v11, %v145_v6 }
  0xf9   :  { %v926_v12 = vpop.f32.mrf.mxu1 }
 0x110   :  { %v400_v13 = vpop.f32.mrf.mxu0 }
 0x111   :  { %v401_v23 = vadd.f32 %v400_v13, %v297_v21 }
 0x112   :  { %v961_v16 = vpop.f32.mrf.mxu0 }
 0x119   :  { %v489_v17 = vpop.f32.mrf.mxu1 }
 0x11a   :  { %v490_v24 = vadd.f32 %v489_v17, %v401_v23 }
 0x11b   :  { %v996_v18 = vpop.f32.mrf.mxu1 }
 0x132   :  { %v608_v19 = vpop.f32.mrf.mxu0 }
 0x133   :  { %v609_v0 = vadd.f32 %v608_v19, %v490_v24 }
 0x134   :  { %v1031_v22 = vpop.f32.mrf.mxu0 }
 0x13b   :  { %v695_v29 = vpop.f32.mrf.mxu1 }
 0x13c   :  { %v696_v31 = vadd.f32 %v695_v29, %v609_v0 }
 0x13d   :  { %v1066_v37 = vpop.f32.mrf.mxu1 }
 0x13e   :  { %v713_v42 = vmul.f32 2.0, %v696_v31 }
 0x140   :  { %v714_v47 = vsub.f32 %v712_v30, %v713_v42 }
 0x142   :  { %v726_v48 = vsel %vm724_vm2, %v714_v47, 0.0  ;;  %v733_v49 = vsel %vm724_vm2, inf, %v714_v47 }
 0x143   :  { %727 = vadd.xlane.f32.xlu1 %v726_v48 }
 0x147   :  { %734 = vmin.xlane.f32.xlu1 %v733_v49 }
 0x1cc   :  { %v728_v57 = vpop.xlane.xlu1 %727 }
 0x1cd   :  { %v729_v59 = vadd.f32 %v728_v57, %v725_v55 }
 0x1cf   :  { %731 = vst.msk [vmem:[#allocation2] sm:$0xff] %vm38_vm1, %v729_v59 }
 0x1d0   :  { %v735_v63 = vpop.xlane.xlu1 %734 }
 0x1d1   :  { %v736_v1 = vmin.f32 %v732_v61, %v735_v63 }
 0x1d3   :  { %737 = vst.msk [vmem:[#allocation3] sm:$0xff] %vm38_vm1, %v736_v1 }
 0x1d6   :  { %v741_v2 = vld [vmem:[#allocation2] sm:$0xff] }
 0x1d7   :  { %v742_v8 = vmul.f32 0.5, %v741_v2 }
 0x1d9   :  { %v743_v15 = vadd.f32 1.0, %v742_v8 }
 0x1da   :  { %v744_v10 = vld [vmem:[#allocation3] sm:$0xff] }
 0x1db   :  { %v745_v27 = vmul.f32 0.5, %v744_v10 }
 0x1dd   :  { %v746_v32 = vsub.f32 %v743_v15, %v745_v27 }
 0x1df   :  { %v747_v33 = vmax.f32 %v746_v32, 0.0 }
 0x1e1   :  { %748 = vst.msk [vmem:[%s1526_s5] sm:$0xff] %vm38_vm1, %v747_v33 }
 0x1e2   :  { %753 = vsyncpa [#allocation5], 1 }

</bundles_post_ra>
